<compile_context>
chip_gen: v7x
topology: tpu7x:2x2x1
jax: 0.10.0
libtpu: 0.0.40
codegen_flags: <defaults>
</compile_context>

<pallas_src>
import functools

import jax
import jax.numpy as jnp
from jax.experimental import pallas as pl
from jax.experimental.pallas import tpu as pltpu


# ----------------------------------------------------------------------------
# Kernel
# ----------------------------------------------------------------------------
def _attention_kernel(x_ref, w_ref, b_ref, u_ref, o_ref, *, valid_s, h_chunk):
    """One batch tile of attention pooling.

    x_ref : (TB, Sp, H) f32  lstm outputs (Sp = S padded to a multiple of 8)
    w_ref : (H, H)           nn.Linear(hidden, hidden) weight, PyTorch
                             [out, in] layout, pre-cast to the compute dtype.
    b_ref : (1, H) f32       its bias
    u_ref : (1, H) f32       nn.Linear(hidden, 1, bias=False) weight
    o_ref : (TB, H)          attention-pooled output
    """
    TB, S, H = x_ref.shape
    compute_dtype = w_ref.dtype

    # Fat MXU operand: merge (TB, Sp) -> TB*Sp rows (layout no-op: Sp % 8 == 0).
    x2 = x_ref[...].reshape(TB * S, H).astype(compute_dtype)

    n_chunks = H // h_chunk
    if n_chunks <= 1:
        # h = tanh(x @ W^T + b): contract against W's *second* axis so the
        # PyTorch [out, in] weight needs no wrapper transpose.
        h_pre = jax.lax.dot_general(
            x2, w_ref[...],
            dimension_numbers=(((1,), (1,)), ((), ())),
            preferred_element_type=jnp.float32)               # (TB*S, H) f32
        h = jnp.tanh(h_pre + b_ref[...])
        # N=1 context projection: VPU multiply + lane reduction, not the MXU.
        s = jnp.sum(h * u_ref[...], axis=-1)                  # (TB*S,)
    else:
        # Large H: never materialize the full tanh output.  Loop over chunks
        # of W's output rows and accumulate the context dot product.
        def body(c, s_acc):
            start = pl.multiple_of(c * h_chunk, h_chunk)
            w_c = w_ref[pl.ds(start, h_chunk), :]             # (h_chunk, H)
            b_c = b_ref[:, pl.ds(start, h_chunk)]             # (1, h_chunk)
            u_c = u_ref[:, pl.ds(start, h_chunk)]             # (1, h_chunk)
            h_pre = jax.lax.dot_general(
                x2, w_c,
                dimension_numbers=(((1,), (1,)), ((), ())),
                preferred_element_type=jnp.float32)           # (TB*S, h_chunk)
            h_c = jnp.tanh(h_pre + b_c)
            return s_acc + jnp.sum(h_c * u_c, axis=-1)

        s = jax.lax.fori_loop(0, n_chunks, body,
                              jnp.zeros((TB * S,), jnp.float32))

    # Lane-dense softmax over the sequence axis (PyTorch dim=1), f32.
    s2 = s.reshape(TB, S)
    if valid_s < S:
        pos = jax.lax.broadcasted_iota(jnp.int32, (TB, S), 1)
        s2 = jnp.where(pos < valid_s, s2, -jnp.inf)           # mask padding
    m = jnp.max(s2, axis=-1, keepdims=True)                   # (TB, 1)
    e = jnp.exp(s2 - m)
    denom = jnp.sum(e, axis=-1, keepdims=True)
    scores = e * pl.reciprocal(denom, approx=True)            # EUP vrcp, free slot

    # Attention-weighted sum over S; re-read x here so its f32 value is not
    # live across the matmul/tanh region above.
    x_raw = x_ref[...]                                        # (TB, Sp, H)
    weighted = jnp.sum(scores[:, :, None] * x_raw, axis=1)    # (TB, H)
    o_ref[...] = weighted.astype(o_ref.dtype)


# ----------------------------------------------------------------------------
# Tile sizing
# ----------------------------------------------------------------------------
def _step_vmem_bytes(tb, sp, h, h_chunk, w_bytes):
    x_tile = 2 * tb * sp * h * 4        # double-buffered x tile (f32)
    interm = 2 * tb * sp * h_chunk * 4  # h_pre + tanh(h) intermediates (f32)
    out = 2 * tb * h * 4                # double-buffered output slab
    small = 4 * tb * sp * 4             # scores / exp / sums
    return x_tile + interm + out + w_bytes + small


def _pick_batch_tile(B, Sp, H, h_chunk, w_bytes, budget_bytes):
    """VMEM- and grid-aware batch tile.

    Prefers (in order): fits the VMEM budget, >= 4 grid steps (pipelining +
    v7x dual-TC sharding), MXU-friendly M = TB*Sp, then the largest TB.
    TB is a multiple of 8 (dense output slab) or B itself.
    """
    if B <= 8:
        return B
    cands = [tb for tb in range(8, B + 1, 8) if B % tb == 0]
    if not cands:
        # Keep the output block equal to the full array extent (layout rule).
        return B
    fitting = [tb for tb in cands
               if _step_vmem_bytes(tb, Sp, H, h_chunk, w_bytes) <= budget_bytes]
    if not fitting:
        fitting = [min(cands)]
    multi = [tb for tb in fitting if B // tb >= 4] or fitting
    mxu = [tb for tb in multi if (tb * Sp) % 256 == 0 and tb * Sp >= 512] or multi
    return max(mxu)


# ----------------------------------------------------------------------------
# Wrapper
# ----------------------------------------------------------------------------
def attention_forward(x, W, b, u, *, compute_dtype=jnp.float32, batch_tile=None):
    """Pallas attention pooling.

    Args:
      x: [B, S, H] float32 lstm outputs.
      W: [H, H] weight of nn.Linear(hidden, hidden) (PyTorch [out, in] layout).
      b: [H]    bias of nn.Linear(hidden, hidden).
      u: [1, H] weight of nn.Linear(hidden, 1, bias=False).
      compute_dtype: dtype fed to the MXU matmul (jnp.bfloat16 on v5e/v6e/v7x
        for ~2x matmul throughput; accumulation/softmax stay f32).
    Returns:
      [B, H] attention-weighted sum.
    """
    B, S, H = x.shape

    # Pad S to a multiple of 8 so the in-kernel reshape is a free layout merge;
    # padded positions are masked inside the kernel.
    Sp = -(-S // 8) * 8
    if Sp != S:
        x = jnp.pad(x, ((0, 0), (0, Sp - S), (0, 0)))

    # Chunk the W projection for realistic Bi-LSTM hidden sizes so the tanh
    # output is never fully materialized.
    h_chunk = 512 if (H >= 1024 and H % 512 == 0) else H

    # Pre-cast W in the wrapper: halves HBM traffic / VMEM for bf16 and avoids
    # a per-grid-step H^2 VPU cast inside the kernel.
    W_in = W if W.dtype == compute_dtype else W.astype(compute_dtype)
    w_bytes = H * H * jnp.dtype(compute_dtype).itemsize  # single-buffered

    budget = 32 << 20  # safe for v7x's default-scoped VMEM; headroom on v5e/v6e
    TB = batch_tile if batch_tile is not None else _pick_batch_tile(
        B, Sp, H, h_chunk, w_bytes, budget)
    assert B % TB == 0, (B, TB)

    est = _step_vmem_bytes(TB, Sp, H, h_chunk, w_bytes)
    cp_kwargs = {"dimension_semantics": ("parallel",)}
    if est > (16 << 20):  # only raise above the tightest (v5e) default limit
        cp_kwargs["vmem_limit_bytes"] = int(min(max(2 * est, 32 << 20), 48 << 20))

    kernel = functools.partial(_attention_kernel, valid_s=S, h_chunk=h_chunk)

    # Constant operands (W, b, u) keep the same block across the whole grid:
    # single-buffer them so no second H^2 weight buffer is allocated.
    const2d = lambda shape: pl.BlockSpec(shape, lambda i: (0, 0),
                                         pipeline_mode=pl.Buffered(1))

    out = pl.pallas_call(
        kernel,
        out_shape=jax.ShapeDtypeStruct((B, H), x.dtype),
        grid=(B // TB,),
        in_specs=[
            pl.BlockSpec((TB, Sp, H), lambda i: (i, 0, 0)),   # batch tile of x
            const2d((H, H)),                                  # W (pre-cast)
            const2d((1, H)),                                  # bias row (f32)
            const2d((1, H)),                                  # context row (f32)
        ],
        out_specs=pl.BlockSpec((TB, H), lambda i: (i, 0)),    # dense slab
        compiler_params=pltpu.CompilerParams(**cp_kwargs),
    )(x, W_in, b.reshape(1, H), u)
    return out


def attention_reference(x, W, b, u):
    """Pure-JAX reference matching the PyTorch forward exactly."""
    tanh_h = jnp.tanh(jnp.einsum("bsh,oh->bso", x, W) + b)   # [B, S, H]
    ctx = jnp.einsum("bsh,oh->bso", tanh_h, u)               # [B, S, 1]
    scores = jax.nn.softmax(ctx, axis=1)
    return jnp.sum(scores * x, axis=1)                       # [B, H]


if __name__ == "__main__":
    B, S, H = 2, 8, 32  # hidden_dim = 32 (double of a 16-unit Bi-LSTM)

    key = jax.random.PRNGKey(0)
    k_x, k_w, k_b, k_u = jax.random.split(key, 4)

    x = jax.random.normal(k_x, (B, S, H), dtype=jnp.float32)
    W = jax.random.normal(k_w, (H, H), dtype=jnp.float32) * (1.0 / jnp.sqrt(H))
    b = jax.random.normal(k_b, (H,), dtype=jnp.float32) * 0.01
    u = jax.random.normal(k_u, (1, H), dtype=jnp.float32) * (1.0 / jnp.sqrt(H))

    # f32 path (tolerance accounts for the approximate EUP reciprocal).
    ref = attention_reference(x, W, b, u)
    out = jax.block_until_ready(attention_forward(x, W, b, u))
    assert out.shape == (B, H), out.shape
    assert jnp.allclose(out, ref, atol=5e-3, rtol=5e-3), (
        f"f32 max abs err {jnp.max(jnp.abs(out - ref))}")

    # S not a multiple of 8 -> wrapper pads + kernel masks padded positions.
    x5 = x[:, :5, :]
    ref5 = attention_reference(x5, W, b, u)
    out5 = jax.block_until_ready(attention_forward(x5, W, b, u))
    assert jnp.allclose(out5, ref5, atol=5e-3, rtol=5e-3), (
        f"padded-S max abs err {jnp.max(jnp.abs(out5 - ref5))}")

    # bf16 MXU path (v5e/v6e/v7x throughput lever); f32 accumulate/softmax.
    out_bf16 = jax.block_until_ready(
        attention_forward(x, W, b, u, compute_dtype=jnp.bfloat16))
    assert jnp.allclose(out_bf16, ref, atol=2e-1, rtol=2e-1), (
        f"bf16 max abs err {jnp.max(jnp.abs(out_bf16 - ref))}")

    print("KERNEL_OK")
</pallas_src>

<mosaic_0001>
module attributes {stable_mosaic.version = 11 : i64} {
  func.func @_attention_kernel(%arg0: i32, %arg1: memref<2x8x32xf32, #tpu.memory_space<vmem>>, %arg2: memref<32x32xf32, #tpu.memory_space<vmem>>, %arg3: memref<1x32xf32, #tpu.memory_space<vmem>>, %arg4: memref<1x32xf32, #tpu.memory_space<vmem>>, %arg5: memref<2x32xf32, #tpu.memory_space<vmem>>) attributes {dimension_semantics = [#tpu.dimension_semantics<parallel>], iteration_bounds = array<i64: 1>, scalar_prefetch = 0 : i64, scratch_operands = 0 : i64, tpu.core_type = #tpu.core_type<tc>, window_params = [{transform_indices = @transform_0, window_bounds = array<i64: 2, 8, 32>}, {pipeline_mode = #tpu.pipeline_mode<synchronous>, transform_indices = @transform_1, window_bounds = array<i64: 32, 32>}, {pipeline_mode = #tpu.pipeline_mode<synchronous>, transform_indices = @transform_2, window_bounds = array<i64: 1, 32>}, {pipeline_mode = #tpu.pipeline_mode<synchronous>, transform_indices = @transform_3, window_bounds = array<i64: 1, 32>}, {transform_indices = @transform_4, window_bounds = array<i64: 2, 32>}]} {
    %c0 = arith.constant 0 : index
    %c0_0 = arith.constant 0 : index
    %c0_1 = arith.constant 0 : index
    %0 = vector.load %arg1[%c0, %c0_0, %c0_1] : memref<2x8x32xf32, #tpu.memory_space<vmem>>, vector<2x8x32xf32>
    %1 = vector.shape_cast %0 : vector<2x8x32xf32> to vector<16x32xf32>
    %c0_2 = arith.constant 0 : index
    %c0_3 = arith.constant 0 : index
    %2 = vector.load %arg2[%c0_2, %c0_3] : memref<32x32xf32, #tpu.memory_space<vmem>>, vector<32x32xf32>
    %cst = arith.constant dense<0.000000e+00> : vector<16x32xf32>
    %3 = tpu.matmul %1, %2, %cst {dimension_numbers = #tpu.dot_dimension_numbers<[1], [1], [0], [0], [0, 0, 1, 0], [], []>} : vector<16x32xf32>, vector<32x32xf32>, vector<16x32xf32> -> vector<16x32xf32>
    %c0_4 = arith.constant 0 : index
    %c0_5 = arith.constant 0 : index
    %4 = vector.load %arg3[%c0_4, %c0_5] : memref<1x32xf32, #tpu.memory_space<vmem>>, vector<1x32xf32>
    %5 = vector.broadcast %4 : vector<1x32xf32> to vector<16x32xf32>
    %6 = arith.addf %3, %5 : vector<16x32xf32>
    %7 = math.tanh %6 : vector<16x32xf32>
    %c0_6 = arith.constant 0 : index
    %c0_7 = arith.constant 0 : index
    %8 = vector.load %arg4[%c0_6, %c0_7] : memref<1x32xf32, #tpu.memory_space<vmem>>, vector<1x32xf32>
    %9 = vector.broadcast %8 : vector<1x32xf32> to vector<16x32xf32>
    %10 = arith.mulf %7, %9 : vector<16x32xf32>
    %cst_8 = arith.constant dense<0.000000e+00> : vector<16xf32>
    %11 = vector.multi_reduction <add>, %10, %cst_8 [1] : vector<16x32xf32> to vector<16xf32>
    %12 = vector.shape_cast %11 : vector<16xf32> to vector<2x8xf32>
    %cst_9 = arith.constant dense<0xFF800000> : vector<2xf32>
    %13 = vector.multi_reduction <maximumf>, %12, %cst_9 [1] : vector<2x8xf32> to vector<2xf32>
    %14 = vector.shape_cast %13 : vector<2xf32> to vector<2x1xf32>
    %15 = vector.broadcast %14 : vector<2x1xf32> to vector<2x8xf32>
    %16 = arith.subf %12, %15 : vector<2x8xf32>
    %17 = math.exp %16 : vector<2x8xf32>
    %cst_10 = arith.constant dense<0.000000e+00> : vector<2xf32>
    %18 = vector.multi_reduction <add>, %17, %cst_10 [1] : vector<2x8xf32> to vector<2xf32>
    %19 = vector.shape_cast %18 : vector<2xf32> to vector<2x1xf32>
    %20 = tpu.reciprocal %19 {approx = true} : vector<2x1xf32> -> vector<2x1xf32>
    %21 = vector.broadcast %20 : vector<2x1xf32> to vector<2x8xf32>
    %22 = arith.mulf %17, %21 : vector<2x8xf32>
    %c0_11 = arith.constant 0 : index
    %c0_12 = arith.constant 0 : index
    %c0_13 = arith.constant 0 : index
    %23 = vector.load %arg1[%c0_11, %c0_12, %c0_13] : memref<2x8x32xf32, #tpu.memory_space<vmem>>, vector<2x8x32xf32>
    %24 = vector.shape_cast %22 : vector<2x8xf32> to vector<2x8x1xf32>
    %25 = vector.broadcast %24 : vector<2x8x1xf32> to vector<2x8x32xf32>
    %26 = arith.mulf %25, %23 : vector<2x8x32xf32>
    %cst_14 = arith.constant dense<0.000000e+00> : vector<2x32xf32>
    %27 = vector.multi_reduction <add>, %26, %cst_14 [1] : vector<2x8x32xf32> to vector<2x32xf32>
    %c0_15 = arith.constant 0 : index
    %c0_16 = arith.constant 0 : index
    %28 = vector.load %arg5[%c0_15, %c0_16] : memref<2x32xf32, #tpu.memory_space<vmem>>, vector<2x32xf32>
    tpu.vector_store %arg5[%c0_15, %c0_16], %27 {strides = array<i32>} : memref<2x32xf32, #tpu.memory_space<vmem>>, vector<2x32xf32>,
    return
  }
  func.func @transform_0(%arg0: i32) -> (i32, i32, i32) {
    %c0_i32 = arith.constant 0 : i32
    %c0_i32_0 = arith.constant 0 : i32
    %c0_i32_1 = arith.constant 0 : i32
    return %arg0, %c0_i32, %c0_i32_0 : i32, i32, i32
  }
  func.func @transform_1(%arg0: i32) -> (i32, i32) {
    %c0_i32 = arith.constant 0 : i32
    %c0_i32_0 = arith.constant 0 : i32
    %c0_i32_1 = arith.constant 0 : i32
    return %c0_i32, %c0_i32_0 : i32, i32
  }
  func.func @transform_2(%arg0: i32) -> (i32, i32) {
    %c0_i32 = arith.constant 0 : i32
    %c0_i32_0 = arith.constant 0 : i32
    %c0_i32_1 = arith.constant 0 : i32
    return %c0_i32, %c0_i32_0 : i32, i32
  }
  func.func @transform_3(%arg0: i32) -> (i32, i32) {
    %c0_i32 = arith.constant 0 : i32
    %c0_i32_0 = arith.constant 0 : i32
    %c0_i32_1 = arith.constant 0 : i32
    return %c0_i32, %c0_i32_0 : i32, i32
  }
  func.func @transform_4(%arg0: i32) -> (i32, i32) {
    %c0_i32 = arith.constant 0 : i32
    %c0_i32_0 = arith.constant 0 : i32
    return %arg0, %c0_i32 : i32, i32
  }
}

</mosaic_0001>

<bundles_post_ra>
// kernel: tpu_custom_call.1
= control target key start
LH: loop header
LB: loop body
LE: loop exit
PB: predicated region body
PF: predicated region fallthrough
CT: control target
= control target key end

     0   :  { %9 = vsyncpa [#allocation3], 0  ;;  %s510_s0 = inlined_call_operand.hbm [shape: f32[2,8,32], index: 0, kind: input, shape index: {}]   ;;  %s511_s1 = inlined_call_operand.hbm [shape: f32[32,32], index: 1, kind: input, shape index: {}]   ;;  %s512_s2 = inlined_call_operand.vmem [shape: f32[1,32], index: 2, kind: input, shape index: {}]   ;;  %s513_s3 = inlined_call_operand.vmem [shape: f32[1,32], index: 3, kind: input, shape index: {}]   ;;  %s514_s4 = inlined_call_operand.hbm [shape: f32[2,32], index: 4, kind: output, shape index: {}]  }
   0x1   :  { %10 = vsyncpa [#allocation6], 0 }
   0x2   :  { %11 = vsyncpa [#allocation4], 0  ;;  %s416_s15 = smov [#allocation2]   ;;  %s344_s19 = scalar_lea.hbm %s510_s0, 256 }
   0x3   :  { %s17_s16 = sshll.u32 %s416_s15, 4  ;;  %p345_p0 = scmp.ne.s32.totalorder %s510_s0, %s344_s19  ;;  %s18_s16 = int_to_ptr.vmem [resolvable:$true] %s17_s16 }
   0x4   :  { %p348_p1 = scmp.lt.u32.totalorder %s344_s19, %s510_s0 }
   0x6   :  { %p350_p2 = pnand %p348_p1, %p345_p0 }
   0x8   :  { %353 = shalt.err (!%p350_p2)
}
   0x9   :  { %s354_s24 = scalar_lea.vmem %s18_s16, 256  ;;  %p359_p4 = scmp.lt.s32.totalorder %s18_s16, %s18_s16 }
   0xa   :  { %p355_p3 = scmp.ne.s32.totalorder %s18_s16, %s354_s24  ;;  %p360_p5 = scmp.lt.s32.totalorder %s354_s24, %s354_s24 }
   0xc   :  { %p361_p6 = por %p360_p5, %p359_p4 }
   0xe   :  { %p362_p7 = pnand %p361_p6, %p355_p3 }
  0x10   :  { %365 = shalt.err (!%p362_p7)
}
  0x11   :  { %s417_s25 = smov 128   ;;  %s418_s26 = smov 8  }
  0x12   :  { %23 = dma.hbm_to_vmem [thread:$0]  %s510_s0, 256, %s18_s16, [#allocation3], %s417_s25, %s417_s25, %s418_s26  }
  0x13   :  { %s419_s29 = smov [#allocation5]   ;;  %s366_s7 = scalar_lea.hbm %s511_s1, 512 }
  0x14   :  { %s29_s30 = sshll.u32 %s419_s29, 4  ;;  %p367_p8 = scmp.ne.s32.totalorder %s511_s1, %s366_s7  ;;  %s30_s30 = int_to_ptr.vmem [resolvable:$true] %s29_s30 }
  0x15   :  { %p370_p9 = scmp.lt.u32.totalorder %s366_s7, %s511_s1 }
  0x17   :  { %p372_p10 = pnand %p370_p9, %p367_p8 }
  0x19   :  { %375 = shalt.err (!%p372_p10)
}
  0x1a   :  { %s376_s12 = scalar_lea.vmem %s30_s30, 512  ;;  %p381_p12 = scmp.lt.s32.totalorder %s30_s30, %s30_s30 }
  0x1b   :  { %p377_p11 = scmp.ne.s32.totalorder %s30_s30, %s376_s12  ;;  %p382_p13 = scmp.lt.s32.totalorder %s376_s12, %s376_s12 }
  0x1d   :  { %p383_p0 = por %p382_p13, %p381_p12 }
  0x1f   :  { %p384_p1 = pnand %p383_p0, %p377_p11 }
  0x21   :  { %387 = shalt.err (!%p384_p1)
}
  0x22   :  { %35 = dma.hbm_to_vmem [thread:$0]  %s511_s1, 512, %s30_s30, [#allocation6], %s417_s25, %s417_s25, %s418_s26  }
  0x23   :  { %410 = dma.done.wait [#allocation3], 256  }
  0x24   :  { %411 = vsyncadd [#allocation3], 4294967040 }
  0x25   :  { %412 = dma.done.wait [#allocation6], 512  }
  0x26   :  { %413 = vsyncadd [#allocation6], 4294966784  ;;  %vm59_vm0 = vcmask 261120   ;;  %v48_v0 = vld [vmem:[#allocation5] sm:$0xff]  ;;  %v49_v1 = vld [vmem:[#allocation5 + $0x8] sm:$0xff]  ;;  %v172_v20 = vlaneseq  ;;  %vm182_vm2 = vcmask 1041409  }
  0x27   :  { %vm315_vm1 = vmpackc.low %vm59_vm0, %vm59_vm0  ;;  %v50_v2 = vld [vmem:[#allocation5 + $0x10] sm:$0xff]  ;;  %v314_v3 = vpack.c.bf16 %v49_v1, %v48_v0  ;;  %v51_v4 = vld [vmem:[#allocation5 + $0x18] sm:$0xff]  ;;  %vm185_vm3 = vcmask 58368   ;;  %v420_v30 = vmov 0   ;;  %vm271_vm4 = vcmask 254976  }
  0x28   :  { %v473_v5 = vld [vmem:[#allocation2] sm:$0xff]  ;;  %v320_v6 = vpack.c.bf16 %v51_v4, %v50_v2  ;;  %v477_v7 = vld [vmem:[#allocation2 + $0x8] sm:$0xff]  ;;  %v173_v21 = vand.u32 127, %v172_v20  ;;  %v175_v22 = vshrl.u32 %v172_v20, 7  ;;  %333 = vset.pattern.permute.xlu0 %v420_v30  ;;  %332 = vset.pattern.permute.xlu1 %v420_v30 }
  0x29   :  { %311 = vmatprep.mubr.msk.f32.mxu0 %vm59_vm0, %v473_v5  ;;  %316 = vmatprep.subr.msk.bf16.mxu0 %vm315_vm1, %v314_v3  ;;  %v289_v8 = vld [vmem:[%s512_s2] ss:$0 sm:$0xff]  ;;  %s421_s2 = smov [#allocation7]  }
  0x2a   :  { %319 = vmatpush3.bf16.xpose.msk.msra.mxu0 %vm315_vm1, %v314_v3  ;;  %v296_v13 = vld [vmem:[%s513_s3] ss:$0 sm:$0xff]  ;;  %v176_v24 = vsub.s32 %v173_v21, %v175_v22  ;;  %v192_v31 = vsub.s32 0, %v175_v22  ;;  %v196_v32 = vsub.s32 1, %v175_v22  ;;  %s279_s3 = sshll.u32 %s421_s2, 4  ;;  %s280_s3 = int_to_ptr.vmem [resolvable:$true] %s279_s3 }
  0x2b   :  { %322 = vmatprep.subr.msk.bf16.mxu0 %vm315_vm1, %v320_v6  ;;  %s388_s17 = scalar_lea.vmem %s280_s3, 32  ;;  %p393_p3 = scmp.lt.s32.totalorder %s280_s3, %s280_s3 }
  0x2c   :  { %p389_p2 = scmp.ne.s32.totalorder %s280_s3, %s388_s17  ;;  %p394_p4 = scmp.lt.s32.totalorder %s388_s17, %s388_s17 }
  0x2e   :  { %p395_p5 = por %p394_p4, %p393_p3 }
  0x30   :  { %p396_p6 = pnand %p395_p5, %p389_p2 }
  0x32   :  { %325 = vmatpush3.bf16.xpose.msk.msra.mxu0 %vm315_vm1, %v320_v6 }
  0x39   :  { %312 = vmatmul.mubr.msk.f32.vlgmr.msra.gmra.mrb[0].mxu0 %vm59_vm0, %v477_v7 }
 0x10c   :  { %v313_v9 = vpop.f32.mrb[0].mxu0 }
 0x10d   :  { %v150_v10 = vadd.f32 %v313_v9, %v289_v8  ;;  %v144_v11 = vpop.f32.mrb[1].mxu0 }
 0x10e   :  { %v145_v12 = vadd.f32 %v289_v8, %v144_v11 }
 0x10f   :  { %334 = vtanh.f32 %v150_v10 }
 0x110   :  { %336 = vtanh.f32 %v145_v12 }
 0x119   :  { %v335_v14 = vpop.eup %334 }
 0x11a   :  { %v337_v15 = vpop.eup %336  ;;  %v163_v18 = vmul.f32 %v335_v14, %v296_v13 }
 0x11b   :  { %v162_v16 = vmul.f32 %v337_v15, %v296_v13 }
 0x11c   :  { %v167_v19 = vsel %vm59_vm0, %v163_v18, 0.0 }
 0x11d   :  { %v164_v17 = vsel %vm59_vm0, %v162_v16, 0.0 }
 0x11e   :  { %165 = vadd.xlane.f32.xlu0 %v164_v17 }
 0x122   :  { %168 = vadd.xlane.f32.xlu0 %v167_v19 }
 0x1ab   :  { %v166_v23 = vpop.xlane.xlu0 %165 }
 0x1ac   :  { %v177_v26 = vrot.slane %v166_v23, %v176_v24 }
 0x1af   :  { %v169_v25 = vpop.xlane.xlu0 %168 }
 0x1b0   :  { %v181_v27 = vrot.slane %v169_v25, %v176_v24 }
 0x1b2   :  { %v183_v28 = vsel %vm182_vm2, %v181_v27, %v177_v26 }
 0x1b3   :  { %v186_v29 = vsel %vm185_vm3, %v183_v28, -inf }
 0x1b4   :  { %187 = vmax.xlane.f32.xlu1 %v186_v29 }
 0x241   :  { %v188_v33 = vpop.xlane.xlu1 %187 }
 0x242   :  { %v193_v34 = vrot.slane %v188_v33, %v192_v31  ;;  %v197_v35 = vrot.slane %v188_v33, %v196_v32 }
 0x244   :  { %v200_v36 = vsub.f32 %v166_v23, %v193_v34  ;;  %v201_v37 = vsub.f32 %v169_v25, %v197_v35 }
 0x246   :  { %v202_v38 = vmul.f32 1.442695, %v200_v36  ;;  %v204_v39 = vmul.f32 1.442695, %v201_v37 }
 0x248   :  { %338 = vpow2.f32 %v202_v38 }
 0x249   :  { %340 = vpow2.f32 %v204_v39 }
 0x252   :  { %v339_v40 = vpop.eup %338 }
 0x253   :  { %v341_v41 = vpop.eup %340  ;;  %209 = vperm.xlu1 %332, %v339_v40  }
 0x254   :  { %212 = vperm.xlu0 %333, %v341_v41  }
 0x2d2   :  { %v210_v42 = vpop.permute.xlu1 %209 }
 0x2d3   :  { %v213_v43 = vpop.permute.xlu0 %212  ;;  %v217_v44 = vrot.slane %v210_v42, %v176_v24 }
 0x2d4   :  { %v221_v45 = vrot.slane %v213_v43, %v176_v24 }
 0x2d6   :  { %v222_v46 = vsel %vm182_vm2, %v221_v45, %v217_v44 }
 0x2d7   :  { %v224_v47 = vsel %vm185_vm3, %v222_v46, 0.0 }
 0x2d8   :  { %225 = vadd.xlane.f32.xlu1 %v224_v47 }
 0x365   :  { %v226_v48 = vpop.xlane.xlu1 %225 }
 0x366   :  { %342 = vrcp.f32 %v226_v48 }
 0x370   :  { %v343_v49 = vpop.eup %342 }
 0x371   :  { %v232_v50 = vrot.slane %v343_v49, %v192_v31  ;;  %v236_v52 = vrot.slane %v343_v49, %v196_v32 }
 0x373   :  { %v239_v51 = vmul.f32 %v339_v40, %v232_v50  ;;  %v240_v53 = vmul.f32 %v341_v41, %v236_v52 }
 0x375   :  { %243 = vperm.xlu0 %333, %v239_v51  }
 0x379   :  { %248 = vperm.xlu0 %333, %v240_v53  }
 0x3f4   :  { %v244_v54 = vpop.permute.xlu0 %243 }
 0x3f5   :  { %v251_v55 = vmul.f32 %v244_v54, %v473_v5 }
 0x3f7   :  { %v253_v56 = vsel %vm59_vm0, %v251_v55, 0.0 }
 0x3f8   :  { %v254_v57 = vrot.slane %v253_v56, 4  ;;  %v249_v58 = vpop.permute.xlu0 %248 }
 0x3f9   :  { %v252_v59 = vmul.f32 %v249_v58, %v477_v7 }
 0x3fa   :  { %v255_v60 = vadd.f32 %v254_v57, %v253_v56 }
 0x3fb   :  { %v260_v61 = vsel %vm59_vm0, %v252_v59, 0.0 }
 0x3fc   :  { %v256_v62 = vrot.slane %v255_v60, 2  ;;  %v261_v63 = vrot.slane %v260_v61, 4 }
 0x3fe   :  { %v257_v0 = vadd.f32 %v256_v62, %v255_v60  ;;  %v262_v1 = vadd.f32 %v261_v63, %v260_v61 }
 0x400   :  { %v263_v2 = vrot.slane %v262_v1, 2  ;;  %v258_v3 = vrot.slane %v257_v0, 1 }
 0x402   :  { %v264_v4 = vadd.f32 %v263_v2, %v262_v1  ;;  %v259_v5 = vadd.f32 %v258_v3, %v257_v0 }
 0x404   :  { %v265_v6 = vrot.slane %v264_v4, 1 }
 0x406   :  { %v266_v8 = vadd.f32 %v265_v6, %v264_v4 }
 0x408   :  { %v269_v9 = vsel %vm182_vm2, %v266_v8, %v259_v5 }
 0x409   :  { %272 = vst.msk [vmem:[#allocation7] sm:$0x3] %vm271_vm4, %v269_v9 }
 0x40a   :  { %399 = shalt.err (!%p396_p6)
}
 0x40b   :  { %s400_s20 = scalar_lea.hbm %s514_s4, 32 }
 0x40c   :  { %p401_p7 = scmp.ne.s32.totalorder %s514_s4, %s400_s20  ;;  %p404_p8 = scmp.lt.u32.totalorder %s400_s20, %s514_s4 }
 0x40e   :  { %p406_p9 = pnand %p404_p8, %p401_p7 }
 0x410   :  { %409 = shalt.err (!%p406_p9)
}
 0x411   :  { %282 = dma.vmem_to_hbm [thread:$0]  %s280_s3, 32, %s514_s4, [#allocation4]  }
 0x412   :  { %414 = dma.done.wait [#allocation4], 32  }
 0x413   :  { %415 = vsyncadd [#allocation4], 4294967264 }
 0x414   :  { %286 = vsyncpa [#allocation3], 1 }
 0x415   :  { %287 = vsyncpa [#allocation6], 1 }
 0x416   :  { %288 = vsyncpa [#allocation4], 1 }

</bundles_post_ra>
